<compile_context>
chip_gen: v5e
topology: v5e:2x2
jax: 0.10.0
libtpu: 0.0.40
codegen_flags: <defaults>
</compile_context>

<pallas_src>
import jax
import jax.numpy as jnp
from jax.experimental import pallas as pl
from jax.experimental.pallas import tpu as pltpu


def _make_kernel(cin, cout, use_vpu):
    def kernel(w_ref, b_ref, x_ref, o_ref):
        # w_ref: [Cout, Cin] f32 (resident across grid)
        # b_ref: [Cout, 1]   f32 (resident across grid)
        # x_ref: [Cin, T]    input dtype (one batch slice, one spatial tile)
        # o_ref: [Cout, T]   input dtype
        x = x_ref[...]
        b = b_ref[...]
        if use_vpu:
            # Unrolled broadcast-FMA over the tiny contraction dim: stays on the
            # VPU, avoids MXU weight-station reloads for K=Cin<=8.
            xf = x.astype(jnp.float32)
            w = w_ref[...]
            acc = w[:, 0:1] * xf[0:1, :]                     # [Cout, T] f32
            for k in range(1, cin):
                acc = acc + w[:, k : k + 1] * xf[k : k + 1, :]
        else:
            w = w_ref[...]
            if w.dtype != x.dtype:
                w = w.astype(x.dtype)
            acc = jnp.dot(w, x, preferred_element_type=jnp.float32)
        o_ref[...] = (acc + b).astype(o_ref.dtype)

    return kernel


def _chip_budgets():
    """Return (tile_footprint_budget_bytes, vmem_limit_bytes) per TPU generation."""
    kind = ""
    try:
        kind = jax.devices()[0].device_kind.lower()
    except Exception:
        pass
    if "v7" in kind:
        # 64 MiB physical VMEM per core: generous tiles but keep headroom.
        return 20 << 20, 44 << 20
    if "v6" in kind:
        return 24 << 20, 56 << 20
    # v5e / unknown: conservative.
    return 12 << 20, 28 << 20


def _pick_spatial_tile(hw, cin, cout, itemsize, max_tile_bytes, min_steps, n_batch):
    """Largest spatial tile (multiple of 128) under the VMEM budget, clamped so
    the grid keeps at least `min_steps` steps (when achievable) for pipelining
    and v7x megacore balance."""
    sub = 8 * max(1, 4 // max(1, min(itemsize, 4)))  # 8 (f32), 16 (bf16), 32 (i8)
    pad_sub = lambda c: max(-(-c // sub) * sub, sub)
    # Double-buffered input+output tiles (array dtype) plus in-kernel f32
    # temporaries (upcast activations + accumulator), per lane column.
    bytes_per_lane = (
        2 * (pad_sub(cin) + pad_sub(cout)) * itemsize
        + (pad_sub(cin) + 2 * pad_sub(cout)) * 4
    )
    cap = max(128, (max_tile_bytes // bytes_per_lane) // 128 * 128)

    hw128 = -(-hw // 128) * 128          # spatial axis padded to lane width
    tile = min(cap, hw128)
    tile = max(128, (tile // 128) * 128)

    # Keep enough grid steps for DMA/compute overlap (and both TCs on v7x busy).
    hw_tiles_at_floor = hw128 // 128
    target_steps = min(min_steps, max(1, n_batch) * hw_tiles_at_floor)
    need_tiles = -(-target_steps // max(1, n_batch))
    tile = min(tile, max(128, (hw128 // need_tiles) // 128 * 128))
    return tile


def out_conv(x, weight, bias):
    """1x1 Conv2d forward (NCHW); semantics match nn.Conv2d(kernel_size=1)."""
    N, Cin, H, W = x.shape
    Cout = weight.shape[0]
    HW = H * W
    itemsize = x.dtype.itemsize

    tile_budget, vmem_limit = _chip_budgets()
    tile = _pick_spatial_tile(HW, Cin, Cout, itemsize, tile_budget,
                              min_steps=8, n_batch=N)

    # Layout plumbing only: NCHW reshapes freely to [N, Cin, HW]; pad the
    # spatial axis to a multiple of the tile so every store is a full,
    # unmasked 128-lane tile.
    HW_pad = pl.cdiv(HW, tile) * tile
    x3 = x.reshape(N, Cin, HW)
    if HW_pad != HW:
        x3 = jnp.pad(x3, ((0, 0), (0, 0), (0, HW_pad - HW)))

    w2 = weight.reshape(Cout, Cin).astype(jnp.float32)       # [Cout, Cin]
    b2 = bias.reshape(Cout, 1).astype(jnp.float32)           # [Cout, 1]

    use_vpu = (Cin <= 8 and Cout <= 8)
    grid = (HW_pad // tile, N)   # spatial axis leading -> splits across v7x cores

    cost = pl.CostEstimate(
        flops=2 * N * HW_pad * Cin * Cout,
        bytes_accessed=(itemsize * N * HW_pad * (Cin + Cout)
                        + 4 * (Cout * Cin + Cout)),
        transcendentals=0,
    )

    out = pl.pallas_call(
        _make_kernel(Cin, Cout, use_vpu),
        out_shape=jax.ShapeDtypeStruct((N, Cout, HW_pad), x.dtype),
        grid=grid,
        in_specs=[
            # Weight/bias: constant index map -> resident in VMEM across steps.
            pl.BlockSpec((Cout, Cin), lambda s, n: (0, 0)),
            pl.BlockSpec((Cout, 1), lambda s, n: (0, 0)),
            # Activations: one batch slice, one spatial tile per grid step.
            pl.BlockSpec((pl.Squeezed(), Cin, tile), lambda s, n: (n, 0, s)),
        ],
        out_specs=pl.BlockSpec((pl.Squeezed(), Cout, tile), lambda s, n: (n, 0, s)),
        compiler_params=pltpu.CompilerParams(
            dimension_semantics=("parallel", "parallel"),
            vmem_limit_bytes=vmem_limit,
        ),
        cost_estimate=cost,
    )(w2, b2, x3)

    if HW_pad != HW:
        out = out[:, :, :HW]
    return out.reshape(N, Cout, H, W)


if __name__ == "__main__":
    key = jax.random.PRNGKey(0)
    kx, kw, kb, k2 = jax.random.split(key, 4)

    N, Cin, Cout, Hs, Ws = 2, 4, 3, 16, 16

    x = jax.random.normal(kx, (N, Cin, Hs, Ws), dtype=jnp.float32)
    # Conv2d parameter shapes: weight [Cout, Cin, 1, 1], bias [Cout].
    bound = 1.0 / (Cin ** 0.5)
    weight = jax.random.uniform(kw, (Cout, Cin, 1, 1), minval=-bound, maxval=bound,
                                dtype=jnp.float32)
    bias = jax.random.uniform(kb, (Cout,), minval=-bound, maxval=bound,
                              dtype=jnp.float32)
    w2d = weight.reshape(Cout, Cin)

    # --- f32, 128-divisible spatial extent ------------------------------------
    y = jax.block_until_ready(out_conv(x, weight, bias))
    ref = jnp.einsum("nchw,oc->nohw", x, w2d) + bias.reshape(1, Cout, 1, 1)
    assert y.shape == (N, Cout, Hs, Ws)
    assert jnp.allclose(y, ref, atol=1e-5, rtol=1e-5)

    # --- f32, non-128-divisible spatial extent (exercises the pad path) -------
    x_odd = jax.random.normal(k2, (1, Cin, 10, 10), dtype=jnp.float32)
    y_odd = jax.block_until_ready(out_conv(x_odd, weight, bias))
    ref_odd = jnp.einsum("nchw,oc->nohw", x_odd, w2d) + bias.reshape(1, Cout, 1, 1)
    assert jnp.allclose(y_odd, ref_odd, atol=1e-5, rtol=1e-5)

    # --- bf16 activations (f32 accumulate in-kernel, bf16 store) --------------
    x_bf = x.astype(jnp.bfloat16)
    y_bf = jax.block_until_ready(out_conv(x_bf, weight, bias))
    ref_bf = (jnp.einsum("nchw,oc->nohw", x_bf.astype(jnp.float32), w2d)
              + bias.reshape(1, Cout, 1, 1))
    assert y_bf.dtype == jnp.bfloat16
    assert jnp.allclose(y_bf.astype(jnp.float32), ref_bf, atol=3e-2, rtol=3e-2)

    print("KERNEL_OK")
</pallas_src>

<mosaic_0001>
module attributes {stable_mosaic.version = 11 : i64} {
  func.func @kernel(%arg0: i32, %arg1: i32, %arg2: memref<3x4xf32, #tpu.memory_space<vmem>>, %arg3: memref<3x1xf32, #tpu.memory_space<vmem>>, %arg4: memref<1x4x128xf32, #tpu.memory_space<vmem>>, %arg5: memref<1x3x128xf32, #tpu.memory_space<vmem>>) attributes {dimension_semantics = [#tpu.dimension_semantics<parallel>, #tpu.dimension_semantics<parallel>], iteration_bounds = array<i64: 2, 2>, scalar_prefetch = 0 : i64, scratch_operands = 0 : i64, tpu.core_type = #tpu.core_type<tc>, window_params = [{pipeline_mode = #tpu.pipeline_mode<synchronous>, transform_indices = @transform_0, window_bounds = array<i64: 3, 4>}, {pipeline_mode = #tpu.pipeline_mode<synchronous>, transform_indices = @transform_1, window_bounds = array<i64: 3, 1>}, {transform_indices = @transform_2, window_bounds = array<i64: 1, 4, 128>}, {transform_indices = @transform_3, window_bounds = array<i64: 1, 3, 128>}]} {
    %c0 = arith.constant 0 : index
    %c0_0 = arith.constant 0 : index
    %c0_1 = arith.constant 0 : index
    %0 = vector.load %arg4[%c0, %c0_0, %c0_1] : memref<1x4x128xf32, #tpu.memory_space<vmem>>, vector<1x4x128xf32>
    %1 = vector.shape_cast %0 : vector<1x4x128xf32> to vector<4x128xf32>
    %c0_2 = arith.constant 0 : index
    %c0_3 = arith.constant 0 : index
    %2 = vector.load %arg3[%c0_2, %c0_3] : memref<3x1xf32, #tpu.memory_space<vmem>>, vector<3x1xf32>
    %c0_4 = arith.constant 0 : index
    %c0_5 = arith.constant 0 : index
    %3 = vector.load %arg2[%c0_4, %c0_5] : memref<3x4xf32, #tpu.memory_space<vmem>>, vector<3x4xf32>
    %4 = vector.extract_strided_slice %3 {offsets = [0, 0], sizes = [3, 1], strides = [1, 1]} : vector<3x4xf32> to vector<3x1xf32>
    %5 = vector.extract_strided_slice %1 {offsets = [0, 0], sizes = [1, 128], strides = [1, 1]} : vector<4x128xf32> to vector<1x128xf32>
    %6 = vector.broadcast %4 : vector<3x1xf32> to vector<3x128xf32>
    %7 = vector.broadcast %5 : vector<1x128xf32> to vector<3x128xf32>
    %8 = arith.mulf %6, %7 : vector<3x128xf32>
    %9 = vector.extract_strided_slice %3 {offsets = [0, 1], sizes = [3, 1], strides = [1, 1]} : vector<3x4xf32> to vector<3x1xf32>
    %10 = vector.extract_strided_slice %1 {offsets = [1, 0], sizes = [1, 128], strides = [1, 1]} : vector<4x128xf32> to vector<1x128xf32>
    %11 = vector.broadcast %9 : vector<3x1xf32> to vector<3x128xf32>
    %12 = vector.broadcast %10 : vector<1x128xf32> to vector<3x128xf32>
    %13 = arith.mulf %11, %12 : vector<3x128xf32>
    %14 = arith.addf %8, %13 : vector<3x128xf32>
    %15 = vector.extract_strided_slice %3 {offsets = [0, 2], sizes = [3, 1], strides = [1, 1]} : vector<3x4xf32> to vector<3x1xf32>
    %16 = vector.extract_strided_slice %1 {offsets = [2, 0], sizes = [1, 128], strides = [1, 1]} : vector<4x128xf32> to vector<1x128xf32>
    %17 = vector.broadcast %15 : vector<3x1xf32> to vector<3x128xf32>
    %18 = vector.broadcast %16 : vector<1x128xf32> to vector<3x128xf32>
    %19 = arith.mulf %17, %18 : vector<3x128xf32>
    %20 = arith.addf %14, %19 : vector<3x128xf32>
    %21 = vector.extract_strided_slice %3 {offsets = [0, 3], sizes = [3, 1], strides = [1, 1]} : vector<3x4xf32> to vector<3x1xf32>
    %22 = vector.extract_strided_slice %1 {offsets = [3, 0], sizes = [1, 128], strides = [1, 1]} : vector<4x128xf32> to vector<1x128xf32>
    %23 = vector.broadcast %21 : vector<3x1xf32> to vector<3x128xf32>
    %24 = vector.broadcast %22 : vector<1x128xf32> to vector<3x128xf32>
    %25 = arith.mulf %23, %24 : vector<3x128xf32>
    %26 = arith.addf %20, %25 : vector<3x128xf32>
    %27 = vector.broadcast %2 : vector<3x1xf32> to vector<3x128xf32>
    %28 = arith.addf %26, %27 : vector<3x128xf32>
    %c0_6 = arith.constant 0 : index
    %c0_7 = arith.constant 0 : index
    %c0_8 = arith.constant 0 : index
    %29 = vector.load %arg5[%c0_6, %c0_7, %c0_8] : memref<1x3x128xf32, #tpu.memory_space<vmem>>, vector<1x3x128xf32>
    %30 = vector.shape_cast %29 : vector<1x3x128xf32> to vector<3x128xf32>
    %31 = vector.shape_cast %28 : vector<3x128xf32> to vector<1x3x128xf32>
    tpu.vector_store %arg5[%c0_6, %c0_7, %c0_8], %31 {strides = array<i32>} : memref<1x3x128xf32, #tpu.memory_space<vmem>>, vector<1x3x128xf32>,
    return
  }
  func.func @transform_0(%arg0: i32, %arg1: i32) -> (i32, i32) {
    %c0_i32 = arith.constant 0 : i32
    %c0_i32_0 = arith.constant 0 : i32
    %c0_i32_1 = arith.constant 0 : i32
    return %c0_i32, %c0_i32_0 : i32, i32
  }
  func.func @transform_1(%arg0: i32, %arg1: i32) -> (i32, i32) {
    %c0_i32 = arith.constant 0 : i32
    %c0_i32_0 = arith.constant 0 : i32
    %c0_i32_1 = arith.constant 0 : i32
    return %c0_i32, %c0_i32_0 : i32, i32
  }
  func.func @transform_2(%arg0: i32, %arg1: i32) -> (i32, i32, i32) {
    %c0_i32 = arith.constant 0 : i32
    %c0_i32_0 = arith.constant 0 : i32
    return %arg1, %c0_i32, %arg0 : i32, i32, i32
  }
  func.func @transform_3(%arg0: i32, %arg1: i32) -> (i32, i32, i32) {
    %c0_i32 = arith.constant 0 : i32
    %c0_i32_0 = arith.constant 0 : i32
    return %arg1, %c0_i32, %arg0 : i32, i32, i32
  }
}

</mosaic_0001>

<bundles_post_ra>
// kernel: tpu_custom_call.1
= control target key start
LH: loop header
LB: loop body
LE: loop exit
PB: predicated region body
PF: predicated region fallthrough
CT: control target
= control target key end

     0   :  { %8 = vsyncpa [#allocation3], 0  ;;  %s683_s0 = inlined_call_operand.vmem [shape: f32[3,4], index: 0, kind: input, shape index: {}]   ;;  %s684_s1 = inlined_call_operand.vmem [shape: f32[3,1], index: 1, kind: input, shape index: {}]   ;;  %s685_s2 = inlined_call_operand.hbm [shape: f32[2,4,256], index: 2, kind: input, shape index: {}]   ;;  %s686_s3 = inlined_call_operand.vmem [shape: f32[2,3,256], index: 3, kind: output, shape index: {}]  }
   0x1   :  { %10 = vsyncpa [#allocation3 + $0x1], 0  ;;  %s562_s12 = smov 0   ;;  %s564_s13 = smov 0  }
   0x2   :  { %s566_s14 = smov 0   ;;  %s568_s15 = smov 0  }
   0x3   :  { %s570_s16 = smov 0   ;;  %s572_s17 = smov 0  }
   0x4   :  { %s574_s18 = smov 0   ;;  %s576_s19 = smov 0  }
   0x5 LB: > { %s346_s20 = sadd.s32 4294967295, %s536_s19   ;;  %s25_s21 = sadd.s32 1, %s528_s17  ;;  %s536_s19 = sphi %s576_s19, %s16_s19   ;;  %s532_s18 = sphi %s574_s18, %s695_s18   ;;  %s528_s17 = sphi %s572_s17, %s694_s17   ;;  %s524_s16 = sphi %s570_s16, %s693_s16   ;;  %s520_s15 = sphi %s568_s15, %s692_s15   ;;  %s516_s14 = sphi %s566_s14, %s691_s14   ;;  %s512_s13 = sphi %s564_s13, %s690_s13   ;;  %s508_s12 = sphi %s562_s12, %s689_s12  }
   0x6   : > { %p26_p0 = scmp.ge.s32.totalorder %s25_s21, 2  ;;  %s28_s22 = sadd.s32 1, %s532_s18 }
   0x7   : > { %s79_s23 = sadd.s32 1, %s516_s14  ;;  %p86_p1 = scmp.ne.s32.totalorder %s516_s14, %s512_s13 }
   0x8   : > { %s697_s21 = smov (%p26_p0, %s25_s21), 0  ;;  %s699_s22 = smov (!%p26_p0, %s28_s22), %s532_s18 }
   0x9   : > { %s74_s24 = ssub.s32 %s528_s17, %s697_s21  ;;  %p87_p2 = scmp.eq.s32.totalorder %s536_s19, 0 }
   0xa   : > { %p30_p3 = scmp.ge.s32.totalorder %s699_s22, 2  ;;  %p92_p4 = scmp.ne.s32.totalorder %s512_s13, %s508_s12 }
   0xb   : > { %p613_p5 = por %p87_p2, %p86_p1  ;;  %p93_p6 = scmp.eq.s32.totalorder %s346_s20, 0 }
   0xc   : > { %s701_s22 = smov (%p30_p3, %s699_s22), 0  ;;  %p365_p8 = scmp.lt.s32.totalorder %s536_s19, 4 }
   0xd   : > { %p619_p7 = por %p93_p6, %p92_p4  ;;  %s75_s27 = ssub.s32 %s532_s18, %s701_s22 }
   0xe   : > { %s76_s28 = sor.u32 %s75_s27, %s74_s24  ;;  %s150_s29 = sand.u32 1, %s516_s14  }
   0xf   : > { %p77_p9 = scmp.eq.s32.totalorder %s76_s28, 0  ;;  %s350_s30 = sshll.u32 %s150_s29, 2 }
  0x10   : > { %s351_s4 = sshll.u32 %s528_s17, 1  ;;  %s154_s8 = scalar_lea.vmem [#allocation2], %s350_s30 }
  0x11   : > { %s629_s5 = scalar_select %p77_p9, %s516_s14, %s79_s23  }
  0x12   : > { %s158_s6 = sadd.s32 %s532_s18, %s351_s4  ;;  %s164_s9 = sshll.u32 %s154_s8, 4  ;;  %s165_s9 = int_to_ptr.vmem [resolvable:$true] %s164_s9 }
  0x13   : > { %s352_s7 = sshll.u32 %s158_s6, 2  ;;  %p362_p10 = pnand %p365_p8, %p613_p5 }
  0x14   : > { %s160_s12 = scalar_lea.hbm %s685_s2, %s352_s7  ;;  %p353_p11 = scmp.ge.s32.totalorder %s536_s19, 1 }
  0x15   : > { %s162_s20 = sshll.u32 %s160_s12, 4  ;;  %p169_p12 = scmp.lt.s32.totalorder %s536_s19, 5  ;;  %s163_s20 = int_to_ptr.hbm [resolvable:$true] %s162_s20 }
  0x16   : > { %s151_s24 = scalar_lea.sflag [#allocation3], %s150_s29 }
  0x17   : > { %364 = dma.hbm_to_vmem [thread:$0]  (!%p362_p10), %s163_s20, 64, %s165_s9, %s151_s24  }
  0x18   : > { %p170_p13 = pnand %p353_p11, %p169_p12 }
  0x19   : > { %s175_s23 = sand.u32 (!%p170_p13), 1, %s512_s13  }
  0x1a   : > { %173 = sbr.rel (%p170_p13) target bundleno = 169 (0xa9), region = 32  ;;  %s354_s27 = sshll.u32 (!%p170_p13), %s175_s23, 2 }
  0x1b   : > { %s176_s28 = scalar_lea.sflag (!%p170_p13), [#allocation3], %s175_s23  ;;  %s179_s30 = scalar_lea.vmem (!%p170_p13), [#allocation2], %s354_s27 }
  0x1f   : > { %503 = dma.done.wait (%p619_p7), %s176_s28, 64  }
  0x20   : > { %505 = vsyncadd (%p619_p7), %s176_s28, 4294967232  ;;  %v538_v0 = vmov 0   ;;  %v539_v1 = vmov 2   ;;  %v216_v2 = vld [vmem:[%s683_s0] sm:$0x7]  ;;  %v540_v4 = vmov 1  }
  0x21   : > { %434 = vset.pattern.permute.xlu0 %v538_v0  ;;  %436 = vset.pattern.permute.xlu1 %v539_v1  ;;  %v215_v3 = vld [vmem:[%s684_s1] sm:$0x7]  ;;  %v541_v5 = vmov 3   ;;  %p206_p0 = scmp.lt.s32.totalorder %s520_s15, 1  ;;  %p208_p1 = scmp.lt.s32.totalorder %s524_s16, 1 }
  0x22   : > { %438 = vset.pattern.permute.xlu2 %v538_v0  ;;  %219 = vperm.xlu0 %434, %v216_v2   ;;  %v214_v8 = vld [vmem:[%s179_s30] sm:$0xf] }
  0x23   : > { %232 = vperm.xlu1 %436, %v216_v2   ;;  %247 = vperm.xlu2 %438, %v215_v3   ;;  %s703_s15 = smov (!%p206_p0, %s520_s15), 1  ;;  %v222_v9 = vperm.slane %v214_v8, 0  ;;  %v228_v10 = vperm.slane %v214_v8, 1  ;;  %s705_s16 = smov (!%p208_p1, %s524_s16), 1  ;;  %v235_v11 = vperm.slane %v214_v8, 2  ;;  %v242_v12 = vperm.slane %v214_v8, 3 }
  0x24   : > { %s355_s26 = sshll.u32 %s703_s15, 1 }
  0x25   : > { %s211_s7 = sadd.s32 %s355_s26, %s705_s16 }
  0x26   : > { %s356_s8 = sshll.u32 %s211_s7, 2 }
  0x27   : > { %s213_s11 = scalar_lea.vmem %s686_s3, %s356_s8 }
  0x2a   : > { %435 = vset.pattern.permute.xlu0 %v540_v4 }
  0x2b   : > { %437 = vset.pattern.permute.xlu1 %v541_v5  ;;  %225 = vperm.xlu0 %435, %v216_v2  }
  0x2c   : > { %239 = vperm.xlu1 %437, %v216_v2  }
  0x33   : > { %439 = vset.pattern.permute.xlu0 %v538_v0 }
  0x7d   : > { %v248_v21 = vpop.permute.xlu2 %247 }
  0x94   : > { %v220_v6 = vpop.permute.xlu0 %219 }
  0x95   : > { %v233_v7 = vpop.permute.xlu1 %232  ;;  %v223_v15 = vmul.f32 %v222_v9, %v220_v6 }
  0x96   : > { %v236_v17 = vmul.f32 %v235_v11, %v233_v7 }
  0x9d   : > { %v226_v13 = vpop.permute.xlu0 %225 }
  0x9e   : > { %v240_v14 = vpop.permute.xlu1 %239  ;;  %v229_v16 = vmul.f32 %v228_v10, %v226_v13 }
  0x9f   : > { %v243_v19 = vmul.f32 %v242_v12, %v240_v14 }
  0xa0   : > { %v230_v18 = vadd.f32 %v229_v16, %v223_v15 }
  0xa2   : > { %v237_v20 = vadd.f32 %v236_v17, %v230_v18 }
  0xa4   : > { %v244_v22 = vadd.f32 %v243_v19, %v237_v20 }
  0xa6   : > { %v250_v23 = vadd.f32 %v248_v21, %v244_v22 }
  0xa8   : > { %251 = vst [vmem:[%s213_s11] sm:$0x7] %v250_v23 }
  0xa9 PF: > { %s16_s19 = sadd.s32 1, %s536_s19   ;;  %s689_s12 = smov %s512_s13 }
  0xaa   : > { %p13_p2 = scmp.ge.s32.totalorder %s16_s19, 6   ;;  %s690_s13 = smov %s516_s14 }
  0xab   : > { %s691_s14 = smov %s629_s5  ;;  %s692_s15 = smov %s528_s17 }
  0xac   : > { %s693_s16 = smov %s532_s18  ;;  %s694_s17 = smov %s697_s21 }
  0xad   : > { %s695_s18 = smov %s701_s22  ;;  %15 = sbr.rel (!%p13_p2) target bundleno = 5 (0x5), region = 72 }
  0xb2   :  { %279 = vsyncpa [#allocation3], 1 }
  0xb3   :  { %281 = vsyncpa [#allocation3 + $0x1], 1 }

</bundles_post_ra>
